<compile_context>
chip_gen: v6e
topology: v6e:2x2x1
jax: 0.10.0
libtpu: 0.0.40
codegen_flags: <defaults>
</compile_context>

<pallas_src>
import functools
import math

import jax
import jax.numpy as jnp
from jax.experimental import pallas as pl
from jax.experimental.pallas import tpu as pltpu


_LANE = 128           # lane width: keep last dims 128-aligned
_BF16_SUBLANE = 16    # bf16 sublane packing: batch tiles are multiples of 16


def _round_up(x, m):
    return ((x + m - 1) // m) * m


def _pad2d(a, rows, cols):
    return jnp.pad(a, ((0, rows - a.shape[0]), (0, cols - a.shape[1])))


# ----------------------------------------------------------------------------
# Generation-aware VMEM budgets + TensorCore count.
# ----------------------------------------------------------------------------
def _query_tpu():
    vmem_cap = 64 * 1024 * 1024          # conservative default (v7x per-TC VMEM)
    try:
        info = pltpu.get_tpu_info()
        vmem_cap = int(getattr(info, "vmem_capacity_bytes", vmem_cap))
    except Exception:
        pass
    multi_tc = False
    try:
        kind = jax.devices()[0].device_kind.lower()
        multi_tc = "v7" in kind          # only v7x has 2 TensorCores per chip
    except Exception:
        pass
    return vmem_cap, multi_tc


_VMEM_CAP, _MULTI_TENSORCORE = _query_tpu()
if _MULTI_TENSORCORE:
    # v7x: 64 MiB per TC; with "parallel" grid axes each TC holds its own weights.
    _VMEM_LIMIT = min((_VMEM_CAP * 3) // 4, 48 * 1024 * 1024)
    _FUSED_VMEM_BUDGET = min(_VMEM_CAP // 2, 30 * 1024 * 1024)
else:
    # v5e / v6e: 128 MiB physical VMEM, single TensorCore.
    _VMEM_LIMIT = min((_VMEM_CAP * 3) // 4, 100 * 1024 * 1024)
    _FUSED_VMEM_BUDGET = min(_VMEM_CAP // 2, 64 * 1024 * 1024)


# ----------------------------------------------------------------------------
# Tiling helpers
# ----------------------------------------------------------------------------
def _choose_block_m(m, target, multi_core=False):
    """Padding-aware batch tile: bm = round_up(cdiv(M, n_tiles), 16).
    On v7x force >=2 grid steps (when the batch allows) so both TCs get work."""
    m = max(int(m), 1)
    n_tiles = pl.cdiv(m, target)
    if multi_core and n_tiles < 2 and m >= 2 * _LANE:
        n_tiles = 2
    bm = _round_up(pl.cdiv(m, n_tiles), _BF16_SUBLANE)
    return bm, bm * n_tiles              # (block_m, padded M)


def _choose_tile(dim, full_extent_max=1024, cap=512):
    """dim is a multiple of 128.  Keep the full extent when small (no K/N split);
    otherwise the largest 128-multiple divisor <= cap (e.g. 384 stays 384)."""
    if dim <= full_extent_max:
        return dim
    for c in range(cap, 0, -_LANE):
        if dim % c == 0:
            return c
    return _LANE


def _tiled_block_m(mp, bm, cap=512):
    """Largest multiple of bm that divides Mp and is <= cap (fewer weight re-reads)."""
    n = mp // bm
    best = bm
    for d in range(1, n + 1):
        if n % d == 0 and bm * d <= cap:
            best = max(best, bm * d)
    return best


# ----------------------------------------------------------------------------
# Fused MLP kernel: a run of layers in one pallas_call, activations stay on-chip.
# ----------------------------------------------------------------------------
def _mlp_fused_kernel(*refs, num_layers, final_relu):
    # refs = (x, w0, b0, w1, b1, ..., w_{L-1}, b_{L-1}, out)
    x_ref = refs[0]
    o_ref = refs[1 + 2 * num_layers]
    h = x_ref[...]                                   # bf16
    for l in range(num_layers):
        w_ref = refs[1 + 2 * l]
        b_ref = refs[2 + 2 * l]
        acc = jnp.dot(h, w_ref[...], preferred_element_type=jnp.float32)
        acc = acc + b_ref[...]                       # f32 bias epilogue
        if l < num_layers - 1 or final_relu:
            acc = jnp.maximum(acc, 0.0)              # f32 ReLU (VPU)
        if l < num_layers - 1:
            h = acc.astype(jnp.bfloat16)             # bf16 into the next matmul
        else:
            o_ref[...] = acc.astype(o_ref.dtype)


def mlp_fused_pallas(x_pad, padded_params, out_dim_pad, block_m, out_dtype,
                     final_relu):
    """x_pad: (Mp, Kp) bf16 with Mp % block_m == 0; feature dims 128-aligned."""
    Mp, Kp = x_pad.shape
    num_layers = len(padded_params)
    args = [x_pad]
    for (w_p, b_p) in padded_params:
        args.extend([w_p, b_p])

    def build(single_buffer):
        in_specs = [pl.BlockSpec((block_m, Kp), lambda i: (i, 0))]
        for (w_p, b_p) in padded_params:
            kl, nl = w_p.shape
            # Constant index_map -> fetched once, VMEM-resident across the grid.
            # Buffered(1): no pointless double-buffering of the resident weights.
            kw = {"pipeline_mode": pl.Buffered(1)} if single_buffer else {}
            in_specs.append(pl.BlockSpec((kl, nl), lambda i: (0, 0), **kw))
            in_specs.append(pl.BlockSpec((1, nl), lambda i: (0, 0), **kw))
        kernel = functools.partial(_mlp_fused_kernel, num_layers=num_layers,
                                   final_relu=final_relu)
        return pl.pallas_call(
            kernel,
            out_shape=jax.ShapeDtypeStruct((Mp, out_dim_pad), out_dtype),
            grid_spec=pltpu.PrefetchScalarGridSpec(
                num_scalar_prefetch=0,
                grid=(Mp // block_m,),
                in_specs=in_specs,
                out_specs=pl.BlockSpec((block_m, out_dim_pad), lambda i: (i, 0)),
            ),
            compiler_params=pltpu.CompilerParams(
                dimension_semantics=("parallel",),
                vmem_limit_bytes=_VMEM_LIMIT,
            ),
        )

    try:
        return build(True)(*args)
    except Exception:
        # pipeline_mode=pl.Buffered(1) unsupported on this jax version / path:
        # fall back to default double-buffering (budget accounting already covers it).
        return build(False)(*args)


# ----------------------------------------------------------------------------
# Fallback: (M, N, K)-tiled single linear layer with f32 accumulator.
# Used per-layer only when that layer's weights are too large to keep resident.
# ----------------------------------------------------------------------------
def _linear_tiled_kernel(x_ref, w_ref, b_ref, o_ref, acc_ref, *, apply_relu):
    @pl.when(pl.program_id(2) == 0)
    def _():
        acc_ref[...] = jnp.zeros_like(acc_ref)

    acc_ref[...] += jnp.dot(x_ref[...], w_ref[...],
                            preferred_element_type=jnp.float32)

    @pl.when(pl.program_id(2) == pl.num_programs(2) - 1)
    def _():
        y = acc_ref[...] + b_ref[...]
        if apply_relu:
            y = jnp.maximum(y, 0.0)
        o_ref[...] = y.astype(o_ref.dtype)


def linear_tiled_pallas(x_pad, w_pad, b2_pad, *, apply_relu, block_m, out_dtype):
    """y = x_pad @ w_pad + b2_pad (optional ReLU); x/w bf16, bias f32."""
    Mp, Kp = x_pad.shape
    _, Np = w_pad.shape
    bm = block_m
    bn = _choose_tile(Np)
    bk = _choose_tile(Kp)
    kernel = functools.partial(_linear_tiled_kernel, apply_relu=apply_relu)
    return pl.pallas_call(
        kernel,
        out_shape=jax.ShapeDtypeStruct((Mp, Np), out_dtype),
        grid_spec=pltpu.PrefetchScalarGridSpec(
            num_scalar_prefetch=0,
            grid=(Mp // bm, Np // bn, Kp // bk),
            in_specs=[
                pl.BlockSpec((bm, bk), lambda i, j, k: (i, k)),
                pl.BlockSpec((bk, bn), lambda i, j, k: (k, j)),
                pl.BlockSpec((1, bn), lambda i, j, k: (0, j)),
            ],
            out_specs=pl.BlockSpec((bm, bn), lambda i, j, k: (i, j)),
            scratch_shapes=[pltpu.VMEM((bm, bn), jnp.float32)],
        ),
        compiler_params=pltpu.CompilerParams(
            dimension_semantics=("parallel", "parallel", "arbitrary"),
            vmem_limit_bytes=_VMEM_LIMIT,
        ),
    )(x_pad, w_pad, b2_pad)


# ----------------------------------------------------------------------------
# MLP module (deterministic PyTorch-style init)
# ----------------------------------------------------------------------------
def _init_linear(key, in_dim, out_dim):
    """torch.nn.Linear default init: U(-1/sqrt(in), 1/sqrt(in))."""
    kw, kb = jax.random.split(key)
    bound = 1.0 / math.sqrt(in_dim)
    w = jax.random.uniform(kw, (out_dim, in_dim), jnp.float32, -bound, bound)
    b = jax.random.uniform(kb, (out_dim,), jnp.float32, -bound, bound)
    return w.T, b  # (in_dim, out_dim), (out_dim,)


class MLPPallas:
    """Pallas port of the PyTorch MLP (use_bn=False, activate_func=relu)."""

    # TODO(synk): BatchNorm1d (use_bn=True) path not implemented; spec default is use_bn=False.
    def __init__(self, num_layers, input_dim, hidden_dim, output_dim, key):
        self.linear_or_not = num_layers == 1
        if self.linear_or_not:
            dims = [input_dim, output_dim]
        else:
            dims = [input_dim] + [hidden_dim] * (num_layers - 1) + [output_dim]
        self.dims = dims
        self.dims_pad = [_round_up(d, _LANE) for d in dims]   # lane-dense features

        keys = jax.random.split(key, len(dims) - 1)
        self.params = []          # unpadded f32, for the pure-JAX references
        self.padded_params = []   # bf16 (Kp, Np) weights + f32 (1, Np) biases
        for i in range(len(dims) - 1):
            w_t, b = _init_linear(keys[i], dims[i], dims[i + 1])
            self.params.append((w_t, b))
            w_p = _pad2d(w_t, self.dims_pad[i], self.dims_pad[i + 1]).astype(jnp.bfloat16)
            b_p = _pad2d(b.reshape(1, -1), 1, self.dims_pad[i + 1])      # f32
            self.padded_params.append((w_p, b_p))

    def _group_vmem_bytes(self, start, end, bm):
        """Fused working set for layers [start, end).  Weights counted at 2x
        (conservative: correct even if Buffered(1) single-buffering is skipped)."""
        wb = 0
        for l in range(start, end):
            kl, nl = self.padded_params[l][0].shape
            wb += 2 * (kl * nl * 2 + nl * 4)                  # bf16 W + f32 b
        io = 2 * bm * self.dims_pad[start] * 2 + 2 * bm * self.dims_pad[end] * 4
        act = 3 * bm * max(self.dims_pad[start:end + 1]) * 4  # f32 intermediates headroom
        return wb + io + act

    def _plan_segments(self, bm):
        """Greedy per-layer plan: contiguous fused groups; oversized layers tiled."""
        L = len(self.padded_params)
        segs, j = [], 0
        while j < L:
            if self._group_vmem_bytes(j, j + 1, bm) > _FUSED_VMEM_BUDGET:
                segs.append(("tiled", j, j + 1))
                j += 1
                continue
            end = j + 1
            while end < L and self._group_vmem_bytes(j, end + 1, bm) <= _FUSED_VMEM_BUDGET:
                end += 1
            segs.append(("fused", j, end))
            j = end
        return segs

    def __call__(self, x, block_m=256):
        M, K = x.shape
        assert K == self.dims[0], (K, self.dims[0])
        L = len(self.padded_params)
        bm, Mp = _choose_block_m(M, block_m, multi_core=_MULTI_TENSORCORE)
        h = _pad2d(x, Mp, self.dims_pad[0]).astype(jnp.bfloat16)

        for kind, s, e in self._plan_segments(bm):
            last_seg = (e == L)
            out_dtype = jnp.float32 if last_seg else jnp.bfloat16
            if kind == "fused":
                h = mlp_fused_pallas(h, self.padded_params[s:e], self.dims_pad[e],
                                     bm, out_dtype, final_relu=not last_seg)
            else:
                # TODO(synk): stream oversized weights inside the fused kernel
                # (memory_space=pl.ANY + pltpu.emit_pipeline) instead of a per-layer
                # HBM round-trip of the activation.
                w_p, b_p = self.padded_params[s]
                h = linear_tiled_pallas(
                    h, w_p, b_p, apply_relu=(s < L - 1),
                    block_m=_tiled_block_m(Mp, bm), out_dtype=out_dtype)
        return h[:M, :self.dims[-1]]


# ----------------------------------------------------------------------------
# Pure-JAX references
# ----------------------------------------------------------------------------
def mlp_ref_f32(params, x):
    h = x
    for i, (w_t, b) in enumerate(params):
        h = h @ w_t + b
        if i < len(params) - 1:
            h = jnp.maximum(h, 0.0)
    return h


def mlp_ref_bf16(params, x):
    """Same bf16-operand / f32-accumulate recipe as the kernel (tight check)."""
    h = x.astype(jnp.bfloat16)
    for i, (w_t, b) in enumerate(params):
        y = jnp.dot(h, w_t.astype(jnp.bfloat16),
                    preferred_element_type=jnp.float32) + b
        if i < len(params) - 1:
            y = jnp.maximum(y, 0.0)
            h = y.astype(jnp.bfloat16)
        else:
            h = y
    return h


if __name__ == "__main__":
    key = jax.random.PRNGKey(0)
    k_param, k_x, k_x2, k_w2, k_b2 = jax.random.split(key, 5)

    # --- small MLP demo (exercises the fused single-kernel path) -----------
    batch, num_layers, input_dim, hidden_dim, output_dim = 8, 3, 16, 32, 8
    mlp = MLPPallas(num_layers, input_dim, hidden_dim, output_dim, k_param)
    x = jax.random.normal(k_x, (batch, input_dim), jnp.float32)

    out = jax.block_until_ready(mlp(x))
    assert out.shape == (batch, output_dim), out.shape
    ref_b = mlp_ref_bf16(mlp.params, x)
    ref_f = mlp_ref_f32(mlp.params, x)
    assert jnp.allclose(out, ref_b, atol=2e-3, rtol=2e-3), "fused MLP vs bf16 ref mismatch"
    # loose semantic sanity check vs the full-f32 PyTorch-equivalent reference
    assert jnp.allclose(out, ref_f, atol=1e-1, rtol=1e-1), "fused MLP vs f32 ref mismatch"

    # --- tiled fallback kernel sanity check (M not tile-aligned, K=384 kept
    #     as a single full-extent tile instead of collapsing to 128) ---------
    M2, K2, N2 = 300, 384, 256
    x2 = jax.random.normal(k_x2, (M2, K2), jnp.float32)
    w2 = jax.random.normal(k_w2, (K2, N2), jnp.float32) * (1.0 / math.sqrt(K2))
    b2 = jax.random.normal(k_b2, (N2,), jnp.float32) * 0.1

    bm2, Mp2 = _choose_block_m(M2, 512, multi_core=_MULTI_TENSORCORE)
    x2_pad = _pad2d(x2, Mp2, K2).astype(jnp.bfloat16)
    out2 = linear_tiled_pallas(x2_pad, w2.astype(jnp.bfloat16), b2.reshape(1, N2),
                               apply_relu=True, block_m=bm2, out_dtype=jnp.float32)
    out2 = jax.block_until_ready(out2)[:M2]
    ref2 = jnp.maximum(
        jnp.dot(x2.astype(jnp.bfloat16), w2.astype(jnp.bfloat16),
                preferred_element_type=jnp.float32) + b2, 0.0)
    assert out2.shape == (M2, N2), out2.shape
    assert jnp.allclose(out2, ref2, atol=2e-3, rtol=2e-3), "tiled linear mismatch"

    print("KERNEL_OK")
</pallas_src>

<mosaic_0001>
module attributes {stable_mosaic.version = 11 : i64} {
  func.func @_mlp_fused_kernel(%arg0: i32, %arg1: memref<16x128xbf16, #tpu.memory_space<vmem>>, %arg2: memref<128x128xbf16, #tpu.memory_space<vmem>>, %arg3: memref<1x128xf32, #tpu.memory_space<vmem>>, %arg4: memref<128x128xbf16, #tpu.memory_space<vmem>>, %arg5: memref<1x128xf32, #tpu.memory_space<vmem>>, %arg6: memref<128x128xbf16, #tpu.memory_space<vmem>>, %arg7: memref<1x128xf32, #tpu.memory_space<vmem>>, %arg8: memref<16x128xf32, #tpu.memory_space<vmem>>) attributes {dimension_semantics = [#tpu.dimension_semantics<parallel>], iteration_bounds = array<i64: 1>, scalar_prefetch = 0 : i64, scratch_operands = 0 : i64, tpu.core_type = #tpu.core_type<tc>, window_params = [{transform_indices = @transform_0, window_bounds = array<i64: 16, 128>}, {pipeline_mode = #tpu.pipeline_mode<synchronous>, transform_indices = @transform_1, window_bounds = array<i64: 128, 128>}, {pipeline_mode = #tpu.pipeline_mode<synchronous>, transform_indices = @transform_2, window_bounds = array<i64: 1, 128>}, {pipeline_mode = #tpu.pipeline_mode<synchronous>, transform_indices = @transform_3, window_bounds = array<i64: 128, 128>}, {pipeline_mode = #tpu.pipeline_mode<synchronous>, transform_indices = @transform_4, window_bounds = array<i64: 1, 128>}, {pipeline_mode = #tpu.pipeline_mode<synchronous>, transform_indices = @transform_5, window_bounds = array<i64: 128, 128>}, {pipeline_mode = #tpu.pipeline_mode<synchronous>, transform_indices = @transform_6, window_bounds = array<i64: 1, 128>}, {transform_indices = @transform_7, window_bounds = array<i64: 16, 128>}]} {
    %c0 = arith.constant 0 : index
    %c0_0 = arith.constant 0 : index
    %0 = vector.load %arg1[%c0, %c0_0] : memref<16x128xbf16, #tpu.memory_space<vmem>>, vector<16x128xbf16>
    %c0_1 = arith.constant 0 : index
    %c0_2 = arith.constant 0 : index
    %1 = vector.load %arg2[%c0_1, %c0_2] : memref<128x128xbf16, #tpu.memory_space<vmem>>, vector<128x128xbf16>
    %cst = arith.constant dense<0.000000e+00> : vector<16x128xf32>
    %2 = tpu.matmul %0, %1, %cst {dimension_numbers = #tpu.dot_dimension_numbers<[1], [0], [0], [1], [0, 0, 1, 1], [], []>} : vector<16x128xbf16>, vector<128x128xbf16>, vector<16x128xf32> -> vector<16x128xf32>
    %c0_3 = arith.constant 0 : index
    %c0_4 = arith.constant 0 : index
    %3 = vector.load %arg3[%c0_3, %c0_4] : memref<1x128xf32, #tpu.memory_space<vmem>>, vector<1x128xf32>
    %4 = vector.broadcast %3 : vector<1x128xf32> to vector<16x128xf32>
    %5 = arith.addf %2, %4 : vector<16x128xf32>
    %cst_5 = arith.constant 0.000000e+00 : f32
    %6 = vector.broadcast %cst_5 : f32 to vector<16x128xf32>
    %7 = arith.maximumf %5, %6 : vector<16x128xf32>
    %8 = arith.truncf %7 : vector<16x128xf32> to vector<16x128xbf16>
    %c0_6 = arith.constant 0 : index
    %c0_7 = arith.constant 0 : index
    %9 = vector.load %arg4[%c0_6, %c0_7] : memref<128x128xbf16, #tpu.memory_space<vmem>>, vector<128x128xbf16>
    %cst_8 = arith.constant dense<0.000000e+00> : vector<16x128xf32>
    %10 = tpu.matmul %8, %9, %cst_8 {dimension_numbers = #tpu.dot_dimension_numbers<[1], [0], [0], [1], [0, 0, 1, 1], [], []>} : vector<16x128xbf16>, vector<128x128xbf16>, vector<16x128xf32> -> vector<16x128xf32>
    %c0_9 = arith.constant 0 : index
    %c0_10 = arith.constant 0 : index
    %11 = vector.load %arg5[%c0_9, %c0_10] : memref<1x128xf32, #tpu.memory_space<vmem>>, vector<1x128xf32>
    %12 = vector.broadcast %11 : vector<1x128xf32> to vector<16x128xf32>
    %13 = arith.addf %10, %12 : vector<16x128xf32>
    %cst_11 = arith.constant 0.000000e+00 : f32
    %14 = vector.broadcast %cst_11 : f32 to vector<16x128xf32>
    %15 = arith.maximumf %13, %14 : vector<16x128xf32>
    %16 = arith.truncf %15 : vector<16x128xf32> to vector<16x128xbf16>
    %c0_12 = arith.constant 0 : index
    %c0_13 = arith.constant 0 : index
    %17 = vector.load %arg6[%c0_12, %c0_13] : memref<128x128xbf16, #tpu.memory_space<vmem>>, vector<128x128xbf16>
    %cst_14 = arith.constant dense<0.000000e+00> : vector<16x128xf32>
    %18 = tpu.matmul %16, %17, %cst_14 {dimension_numbers = #tpu.dot_dimension_numbers<[1], [0], [0], [1], [0, 0, 1, 1], [], []>} : vector<16x128xbf16>, vector<128x128xbf16>, vector<16x128xf32> -> vector<16x128xf32>
    %c0_15 = arith.constant 0 : index
    %c0_16 = arith.constant 0 : index
    %19 = vector.load %arg7[%c0_15, %c0_16] : memref<1x128xf32, #tpu.memory_space<vmem>>, vector<1x128xf32>
    %20 = vector.broadcast %19 : vector<1x128xf32> to vector<16x128xf32>
    %21 = arith.addf %18, %20 : vector<16x128xf32>
    %c0_17 = arith.constant 0 : index
    %c0_18 = arith.constant 0 : index
    %22 = vector.load %arg8[%c0_17, %c0_18] : memref<16x128xf32, #tpu.memory_space<vmem>>, vector<16x128xf32>
    tpu.vector_store %arg8[%c0_17, %c0_18], %21 {strides = array<i32>} : memref<16x128xf32, #tpu.memory_space<vmem>>, vector<16x128xf32>,
    return
  }
  func.func @transform_0(%arg0: i32) -> (i32, i32) {
    %c0_i32 = arith.constant 0 : i32
    %c0_i32_0 = arith.constant 0 : i32
    return %arg0, %c0_i32 : i32, i32
  }
  func.func @transform_1(%arg0: i32) -> (i32, i32) {
    %c0_i32 = arith.constant 0 : i32
    %c0_i32_0 = arith.constant 0 : i32
    %c0_i32_1 = arith.constant 0 : i32
    return %c0_i32, %c0_i32_0 : i32, i32
  }
  func.func @transform_2(%arg0: i32) -> (i32, i32) {
    %c0_i32 = arith.constant 0 : i32
    %c0_i32_0 = arith.constant 0 : i32
    %c0_i32_1 = arith.constant 0 : i32
    return %c0_i32, %c0_i32_0 : i32, i32
  }
  func.func @transform_3(%arg0: i32) -> (i32, i32) {
    %c0_i32 = arith.constant 0 : i32
    %c0_i32_0 = arith.constant 0 : i32
    %c0_i32_1 = arith.constant 0 : i32
    return %c0_i32, %c0_i32_0 : i32, i32
  }
  func.func @transform_4(%arg0: i32) -> (i32, i32) {
    %c0_i32 = arith.constant 0 : i32
    %c0_i32_0 = arith.constant 0 : i32
    %c0_i32_1 = arith.constant 0 : i32
    return %c0_i32, %c0_i32_0 : i32, i32
  }
  func.func @transform_5(%arg0: i32) -> (i32, i32) {
    %c0_i32 = arith.constant 0 : i32
    %c0_i32_0 = arith.constant 0 : i32
    %c0_i32_1 = arith.constant 0 : i32
    return %c0_i32, %c0_i32_0 : i32, i32
  }
  func.func @transform_6(%arg0: i32) -> (i32, i32) {
    %c0_i32 = arith.constant 0 : i32
    %c0_i32_0 = arith.constant 0 : i32
    %c0_i32_1 = arith.constant 0 : i32
    return %c0_i32, %c0_i32_0 : i32, i32
  }
  func.func @transform_7(%arg0: i32) -> (i32, i32) {
    %c0_i32 = arith.constant 0 : i32
    %c0_i32_0 = arith.constant 0 : i32
    return %arg0, %c0_i32 : i32, i32
  }
}

module attributes {stable_mosaic.version = 11 : i64} {
  func.func @_mlp_fused_kernel(%arg0: i32, %arg1: memref<16x128xbf16, #tpu.memory_space<vmem>>, %arg2: memref<128x128xbf16, #tpu.memory_space<vmem>>, %arg3: memref<1x128xf32, #tpu.memory_space<vmem>>, %arg4: memref<128x128xbf16, #tpu.memory_space<vmem>>, %arg5: memref<1x128xf32, #tpu.memory_space<vmem>>, %arg6: memref<128x128xbf16, #tpu.memory_space<vmem>>, %arg7: memref<1x128xf32, #tpu.memory_space<vmem>>, %arg8: memref<16x128xf32, #tpu.memory_space<vmem>>) attributes {dimension_semantics = [#tpu.dimension_semantics<parallel>], iteration_bounds = array<i64: 1>, scalar_prefetch = 0 : i64, scratch_operands = 0 : i64, tpu.core_type = #tpu.core_type<tc>, window_params = [{transform_indices = @transform_0, window_bounds = array<i64: 16, 128>}, {pipeline_mode = #tpu.pipeline_mode<synchronous>, transform_indices = @transform_1, window_bounds = array<i64: 128, 128>}, {pipeline_mode = #tpu.pipeline_mode<synchronous>, transform_indices = @transform_2, window_bounds = array<i64: 1, 128>}, {pipeline_mode = #tpu.pipeline_mode<synchronous>, transform_indices = @transform_3, window_bounds = array<i64: 128, 128>}, {pipeline_mode = #tpu.pipeline_mode<synchronous>, transform_indices = @transform_4, window_bounds = array<i64: 1, 128>}, {pipeline_mode = #tpu.pipeline_mode<synchronous>, transform_indices = @transform_5, window_bounds = array<i64: 128, 128>}, {pipeline_mode = #tpu.pipeline_mode<synchronous>, transform_indices = @transform_6, window_bounds = array<i64: 1, 128>}, {transform_indices = @transform_7, window_bounds = array<i64: 16, 128>}]} {
    %c0 = arith.constant 0 : index
    %c0_0 = arith.constant 0 : index
    %0 = vector.load %arg1[%c0, %c0_0] : memref<16x128xbf16, #tpu.memory_space<vmem>>, vector<16x128xbf16>
    %c0_1 = arith.constant 0 : index
    %c0_2 = arith.constant 0 : index
    %1 = vector.load %arg2[%c0_1, %c0_2] : memref<128x128xbf16, #tpu.memory_space<vmem>>, vector<128x128xbf16>
    %cst = arith.constant dense<0.000000e+00> : vector<16x128xf32>
    %2 = tpu.matmul %0, %1, %cst {dimension_numbers = #tpu.dot_dimension_numbers<[1], [0], [0], [1], [0, 0, 1, 1], [], []>} : vector<16x128xbf16>, vector<128x128xbf16>, vector<16x128xf32> -> vector<16x128xf32>
    %c0_3 = arith.constant 0 : index
    %c0_4 = arith.constant 0 : index
    %3 = vector.load %arg3[%c0_3, %c0_4] : memref<1x128xf32, #tpu.memory_space<vmem>>, vector<1x128xf32>
    %4 = vector.broadcast %3 : vector<1x128xf32> to vector<16x128xf32>
    %5 = arith.addf %2, %4 : vector<16x128xf32>
    %cst_5 = arith.constant 0.000000e+00 : f32
    %6 = vector.broadcast %cst_5 : f32 to vector<16x128xf32>
    %7 = arith.maximumf %5, %6 : vector<16x128xf32>
    %8 = arith.truncf %7 : vector<16x128xf32> to vector<16x128xbf16>
    %c0_6 = arith.constant 0 : index
    %c0_7 = arith.constant 0 : index
    %9 = vector.load %arg4[%c0_6, %c0_7] : memref<128x128xbf16, #tpu.memory_space<vmem>>, vector<128x128xbf16>
    %cst_8 = arith.constant dense<0.000000e+00> : vector<16x128xf32>
    %10 = tpu.matmul %8, %9, %cst_8 {dimension_numbers = #tpu.dot_dimension_numbers<[1], [0], [0], [1], [0, 0, 1, 1], [], []>} : vector<16x128xbf16>, vector<128x128xbf16>, vector<16x128xf32> -> vector<16x128xf32>
    %c0_9 = arith.constant 0 : index
    %c0_10 = arith.constant 0 : index
    %11 = vector.load %arg5[%c0_9, %c0_10] : memref<1x128xf32, #tpu.memory_space<vmem>>, vector<1x128xf32>
    %12 = vector.broadcast %11 : vector<1x128xf32> to vector<16x128xf32>
    %13 = arith.addf %10, %12 : vector<16x128xf32>
    %cst_11 = arith.constant 0.000000e+00 : f32
    %14 = vector.broadcast %cst_11 : f32 to vector<16x128xf32>
    %15 = arith.maximumf %13, %14 : vector<16x128xf32>
    %16 = arith.truncf %15 : vector<16x128xf32> to vector<16x128xbf16>
    %c0_12 = arith.constant 0 : index
    %c0_13 = arith.constant 0 : index
    %17 = vector.load %arg6[%c0_12, %c0_13] : memref<128x128xbf16, #tpu.memory_space<vmem>>, vector<128x128xbf16>
    %cst_14 = arith.constant dense<0.000000e+00> : vector<16x128xf32>
    %18 = tpu.matmul %16, %17, %cst_14 {dimension_numbers = #tpu.dot_dimension_numbers<[1], [0], [0], [1], [0, 0, 1, 1], [], []>} : vector<16x128xbf16>, vector<128x128xbf16>, vector<16x128xf32> -> vector<16x128xf32>
    %c0_15 = arith.constant 0 : index
    %c0_16 = arith.constant 0 : index
    %19 = vector.load %arg7[%c0_15, %c0_16] : memref<1x128xf32, #tpu.memory_space<vmem>>, vector<1x128xf32>
    %20 = vector.broadcast %19 : vector<1x128xf32> to vector<16x128xf32>
    %21 = arith.addf %18, %20 : vector<16x128xf32>
    %c0_17 = arith.constant 0 : index
    %c0_18 = arith.constant 0 : index
    %22 = vector.load %arg8[%c0_17, %c0_18] : memref<16x128xf32, #tpu.memory_space<vmem>>, vector<16x128xf32>
    tpu.vector_store %arg8[%c0_17, %c0_18], %21 {strides = array<i32>} : memref<16x128xf32, #tpu.memory_space<vmem>>, vector<16x128xf32>,
    return
  }
  func.func @transform_0(%arg0: i32) -> (i32, i32) {
    %c0_i32 = arith.constant 0 : i32
    %c0_i32_0 = arith.constant 0 : i32
    return %arg0, %c0_i32 : i32, i32
  }
  func.func @transform_1(%arg0: i32) -> (i32, i32) {
    %c0_i32 = arith.constant 0 : i32
    %c0_i32_0 = arith.constant 0 : i32
    %c0_i32_1 = arith.constant 0 : i32
    return %c0_i32, %c0_i32_0 : i32, i32
  }
  func.func @transform_2(%arg0: i32) -> (i32, i32) {
    %c0_i32 = arith.constant 0 : i32
    %c0_i32_0 = arith.constant 0 : i32
    %c0_i32_1 = arith.constant 0 : i32
    return %c0_i32, %c0_i32_0 : i32, i32
  }
  func.func @transform_3(%arg0: i32) -> (i32, i32) {
    %c0_i32 = arith.constant 0 : i32
    %c0_i32_0 = arith.constant 0 : i32
    %c0_i32_1 = arith.constant 0 : i32
    return %c0_i32, %c0_i32_0 : i32, i32
  }
  func.func @transform_4(%arg0: i32) -> (i32, i32) {
    %c0_i32 = arith.constant 0 : i32
    %c0_i32_0 = arith.constant 0 : i32
    %c0_i32_1 = arith.constant 0 : i32
    return %c0_i32, %c0_i32_0 : i32, i32
  }
  func.func @transform_5(%arg0: i32) -> (i32, i32) {
    %c0_i32 = arith.constant 0 : i32
    %c0_i32_0 = arith.constant 0 : i32
    %c0_i32_1 = arith.constant 0 : i32
    return %c0_i32, %c0_i32_0 : i32, i32
  }
  func.func @transform_6(%arg0: i32) -> (i32, i32) {
    %c0_i32 = arith.constant 0 : i32
    %c0_i32_0 = arith.constant 0 : i32
    %c0_i32_1 = arith.constant 0 : i32
    return %c0_i32, %c0_i32_0 : i32, i32
  }
  func.func @transform_7(%arg0: i32) -> (i32, i32) {
    %c0_i32 = arith.constant 0 : i32
    %c0_i32_0 = arith.constant 0 : i32
    return %arg0, %c0_i32 : i32, i32
  }
}

</mosaic_0001>

<bundles_post_ra>
// kernel: tpu_custom_call.1
= control target key start
LH: loop header
LB: loop body
LE: loop exit
PB: predicated region body
PF: predicated region fallthrough
CT: control target
= control target key end

     0   :  { %12 = vsyncpa [#allocation3], 0  ;;  %s830_s0 = inlined_call_operand.hbm [shape: bf16[16,128], index: 0, kind: input, shape index: {}]   ;;  %s831_s1 = inlined_call_operand.hbm [shape: bf16[128,128], index: 1, kind: input, shape index: {}]   ;;  %s832_s2 = inlined_call_operand.vmem [shape: f32[1,128], index: 2, kind: input, shape index: {}]   ;;  %s833_s3 = inlined_call_operand.hbm [shape: bf16[128,128], index: 3, kind: input, shape index: {}]   ;;  %s834_s4 = inlined_call_operand.vmem [shape: f32[1,128], index: 4, kind: input, shape index: {}]   ;;  %s835_s5 = inlined_call_operand.hbm [shape: bf16[128,128], index: 5, kind: input, shape index: {}]   ;;  %s836_s6 = inlined_call_operand.vmem [shape: f32[1,128], index: 6, kind: input, shape index: {}]   ;;  %s837_s7 = inlined_call_operand.hbm [shape: f32[16,128], index: 7, kind: output, shape index: {}]  }
   0x1   :  { %13 = vsyncpa [#allocation6], 0 }
   0x2   :  { %14 = vsyncpa [#allocation9], 0 }
   0x3   :  { %15 = vsyncpa [#allocation4], 0  ;;  %s713_s24 = smov [#allocation5]   ;;  %s714_s26 = smov [#allocation2]  }
   0x4   :  { %s33_s25 = sshll.u32 %s713_s24, 4  ;;  %s21_s27 = sshll.u32 %s714_s26, 4  ;;  %s34_s25 = int_to_ptr.vmem [resolvable:$true] %s33_s25  ;;  %s22_s27 = int_to_ptr.vmem [resolvable:$true] %s21_s27 }
   0x5   :  { %s613_s28 = scalar_lea.vmem %s34_s25, 1024  ;;  %p618_p1 = scmp.lt.s32.totalorder %s34_s25, %s34_s25 }
   0x6   :  { %p614_p0 = scmp.ne.s32.totalorder %s34_s25, %s613_s28  ;;  %p619_p2 = scmp.lt.s32.totalorder %s613_s28, %s613_s28 }
   0x8   :  { %p620_p3 = por %p619_p2, %p618_p1 }
   0xa   :  { %p621_p4 = pnand %p620_p3, %p614_p0 }
   0xc   :  { %624 = shalt.err (!%p621_p4)
}
   0xd   :  { %s715_s29 = smov 64   ;;  %s716_s30 = smov 4  }
   0xe   :  { %39 = dma.hbm_to_vmem [thread:$0]  %s831_s1, 1024, %s34_s25, [#allocation6], %s715_s29, %s715_s29, %s716_s30  }
   0xf   :  { %s633_s10 = scalar_lea.vmem %s22_s27, 128  ;;  %p638_p6 = scmp.lt.s32.totalorder %s22_s27, %s22_s27 }
  0x10   :  { %p634_p5 = scmp.ne.s32.totalorder %s22_s27, %s633_s10  ;;  %p639_p7 = scmp.lt.s32.totalorder %s633_s10, %s633_s10 }
  0x12   :  { %p640_p8 = por %p639_p7, %p638_p6 }
  0x14   :  { %p641_p9 = pnand %p640_p8, %p634_p5 }
  0x16   :  { %644 = shalt.err (!%p641_p9)
}
  0x17   :  { %27 = dma.hbm_to_vmem [thread:$0]  %s830_s0, 128, %s22_s27, [#allocation3], %s715_s29, %s715_s29, %s716_s30  }
  0x18   :  { %s717_s13 = smov [#allocation7]   ;;  %s718_s15 = smov [#allocation8]  }
  0x19   :  { %s47_s14 = sshll.u32 %s717_s13, 4  ;;  %s61_s16 = sshll.u32 %s718_s15, 4  ;;  %s48_s14 = int_to_ptr.vmem [resolvable:$true] %s47_s14  ;;  %s62_s16 = int_to_ptr.vmem [resolvable:$true] %s61_s16 }
  0x1a   :  { %s653_s1 = scalar_lea.vmem %s48_s14, 1024  ;;  %p658_p11 = scmp.lt.s32.totalorder %s48_s14, %s48_s14 }
  0x1b   :  { %p654_p10 = scmp.ne.s32.totalorder %s48_s14, %s653_s1  ;;  %p659_p12 = scmp.lt.s32.totalorder %s653_s1, %s653_s1 }
  0x1d   :  { %p660_p13 = por %p659_p12, %p658_p11 }
  0x1f   :  { %p661_p0 = pnand %p660_p13, %p654_p10 }
  0x21   :  { %664 = shalt.err (!%p661_p0)
}
  0x22   :  { %53 = dma.hbm_to_vmem [thread:$0]  %s833_s3, 1024, %s48_s14, [#allocation6], %s715_s29, %s715_s29, %s716_s30  }
  0x23   :  { %s673_s0 = scalar_lea.vmem %s62_s16, 1024  ;;  %p678_p2 = scmp.lt.s32.totalorder %s62_s16, %s62_s16 }
  0x24   :  { %p674_p1 = scmp.ne.s32.totalorder %s62_s16, %s673_s0  ;;  %p679_p3 = scmp.lt.s32.totalorder %s673_s0, %s673_s0 }
  0x26   :  { %p680_p4 = por %p679_p3, %p678_p2 }
  0x28   :  { %p681_p5 = pnand %p680_p4, %p674_p1 }
  0x2a   :  { %684 = shalt.err (!%p681_p5)
}
  0x2b   :  { %67 = dma.hbm_to_vmem [thread:$0]  %s835_s5, 1024, %s62_s16, [#allocation9], %s715_s29, %s715_s29, %s716_s30  }
  0x2c   :  { %705 = dma.done.wait [#allocation3], 128  }
  0x2d   :  { %706 = vsyncadd [#allocation3], 4294967168 }
  0x2e   :  { %707 = dma.done.wait [#allocation6], 2048  }
  0x2f   :  { %708 = vsyncadd [#allocation6], 4294965248 }
  0x30   :  { %709 = dma.done.wait [#allocation9], 1024  }
  0x31   :  { %710 = vsyncadd [#allocation9], 4294966272  ;;  %v719_v0 = vmov 0.0   ;;  %vm720_vm0 = vmmov 0   ;;  %v580_v1 = vld [vmem:[#allocation5 + $0x38] sm:$0xff]   ;;  %v581_v2 = vld [vmem:[#allocation5 + $0x30] sm:$0xff]  }
  0x32   :  { %509 = vmatprep.subr.bf16.mxu0 %v719_v0  ;;  %525 = vmatprep.mubr.msk.bf16.mxu0 %vm720_vm0, %v719_v0  ;;  %v582_v3 = vld [vmem:[#allocation5 + $0x28] sm:$0xff]   ;;  %v589_v4 = vld [vmem:[#allocation7 + $0x38] sm:$0xff]   ;;  %v583_v5 = vld [vmem:[#allocation5 + $0x20] sm:$0xff]   ;;  %s721_s24 = smov [#allocation10]  }
  0x33   :  { %529 = vmatprep.subr.bf16.mxu1 %v719_v0  ;;  %545 = vmatprep.mubr.msk.bf16.mxu1 %vm720_vm0, %v719_v0  ;;  %v590_v6 = vld [vmem:[#allocation7 + $0x30] sm:$0xff]   ;;  %v584_v7 = vld [vmem:[#allocation5 + $0x18] sm:$0xff]   ;;  %v591_v8 = vld [vmem:[#allocation7 + $0x28] sm:$0xff]   ;;  %s440_s25 = sshll.u32 %s721_s24, 4  ;;  %s441_s25 = int_to_ptr.vmem [resolvable:$true] %s440_s25 }
  0x34   :  { %510 = vmatpush3.bf16.msra.mxu0 %v580_v1  ;;  %530 = vmatpush3.bf16.msra.mxu1 %v589_v4  ;;  %v585_v9 = vld [vmem:[#allocation5 + $0x10] sm:$0xff]   ;;  %v592_v10 = vld [vmem:[#allocation7 + $0x20] sm:$0xff]   ;;  %v586_v11 = vld [vmem:[#allocation5 + $0x8] sm:$0xff]   ;;  %p690_p7 = scmp.lt.s32.totalorder %s441_s25, %s441_s25 }
  0x35   :  { %511 = vmatprep.subr.bf16.mxu0 %v719_v0  ;;  %531 = vmatprep.subr.bf16.mxu1 %v719_v0  ;;  %v593_v12 = vld [vmem:[#allocation7 + $0x18] sm:$0xff]   ;;  %v587_v13 = vld [vmem:[#allocation5] sm:$0xff]   ;;  %v594_v15 = vld [vmem:[#allocation7 + $0x10] sm:$0xff]  }
  0x36   :  { %v588_v14 = vld [vmem:[#allocation2] sm:$0xff]   ;;  %v595_v16 = vld [vmem:[#allocation7 + $0x8] sm:$0xff]   ;;  %v596_v17 = vld [vmem:[#allocation7] sm:$0xff]  }
  0x37   :  { %v597_v18 = vld [vmem:[#allocation8 + $0x38] sm:$0xff]   ;;  %v598_v19 = vld [vmem:[#allocation8 + $0x30] sm:$0xff]   ;;  %v599_v20 = vld [vmem:[#allocation8 + $0x28] sm:$0xff]  }
  0x38   :  { %512 = vmatpush3.bf16.msra.mxu0 %v581_v2  ;;  %532 = vmatpush3.bf16.msra.mxu1 %v590_v6  ;;  %v600_v21 = vld [vmem:[#allocation8 + $0x20] sm:$0xff]   ;;  %v601_v22 = vld [vmem:[#allocation8 + $0x18] sm:$0xff]   ;;  %v602_v33 = vld [vmem:[#allocation8 + $0x10] sm:$0xff]  }
  0x39   :  { %513 = vmatprep.subr.bf16.mxu0 %v719_v0  ;;  %533 = vmatprep.subr.bf16.mxu1 %v719_v0  ;;  %v454_v23 = vld [vmem:[%s832_s2] ss:$0 sm:$0xff]  ;;  %v603_v34 = vld [vmem:[#allocation8 + $0x8] sm:$0xff]   ;;  %v604_v35 = vld [vmem:[#allocation8] sm:$0xff]  }
  0x3a   :  { %v464_v36 = vld [vmem:[%s834_s4] ss:$0 sm:$0xff]  ;;  %s685_s4 = scalar_lea.vmem %s441_s25, 256 }
  0x3b   :  { %v473_v46 = vld [vmem:[%s836_s6] ss:$0 sm:$0xff]  ;;  %p686_p6 = scmp.ne.s32.totalorder %s441_s25, %s685_s4  ;;  %p691_p8 = scmp.lt.s32.totalorder %s685_s4, %s685_s4 }
  0x3c   :  { %514 = vmatpush3.bf16.msra.mxu0 %v582_v3  ;;  %534 = vmatpush3.bf16.msra.mxu1 %v591_v8 }
  0x3d   :  { %515 = vmatprep.subr.bf16.mxu0 %v719_v0  ;;  %535 = vmatprep.subr.bf16.mxu1 %v719_v0  ;;  %p692_p9 = por %p691_p8, %p690_p7 }
  0x3f   :  { %p693_p10 = pnand %p692_p9, %p686_p6 }
  0x40   :  { %516 = vmatpush3.bf16.msra.mxu0 %v583_v5  ;;  %536 = vmatpush3.bf16.msra.mxu1 %v592_v10 }
  0x41   :  { %517 = vmatprep.subr.bf16.mxu0 %v719_v0  ;;  %537 = vmatprep.subr.bf16.mxu1 %v719_v0 }
  0x44   :  { %518 = vmatpush3.bf16.msra.mxu0 %v584_v7  ;;  %538 = vmatpush3.bf16.msra.mxu1 %v593_v12 }
  0x45   :  { %519 = vmatprep.subr.bf16.mxu0 %v719_v0  ;;  %539 = vmatprep.subr.bf16.mxu1 %v719_v0 }
  0x48   :  { %520 = vmatpush3.bf16.msra.mxu0 %v585_v9  ;;  %540 = vmatpush3.bf16.msra.mxu1 %v594_v15 }
  0x49   :  { %521 = vmatprep.subr.bf16.mxu0 %v719_v0  ;;  %541 = vmatprep.subr.bf16.mxu1 %v719_v0 }
  0x4c   :  { %522 = vmatpush3.bf16.msra.mxu0 %v586_v11  ;;  %542 = vmatpush3.bf16.msra.mxu1 %v595_v16 }
  0x4d   :  { %523 = vmatprep.subr.bf16.mxu0 %v719_v0  ;;  %543 = vmatprep.subr.bf16.mxu1 %v719_v0 }
  0x50   :  { %524 = vmatpush3.bf16.msra.mxu0 %v587_v13  ;;  %544 = vmatpush3.bf16.msra.mxu1 %v596_v17 }
  0x51   :  { %549 = vmatprep.subr.bf16.mxu0 %v719_v0 }
  0x53   :  { %526 = vmatmul.mubr.bf16.vlgmr.msra.gmra.mxu0 %v588_v14 }
  0x54   :  { %565 = vmatprep.mubr.msk.bf16.mxu0 %vm720_vm0, %v719_v0  ;;  %550 = vmatpush3.bf16.msra.mxu0 %v597_v18 }
  0x55   :  { %551 = vmatprep.subr.bf16.mxu0 %v719_v0 }
  0x58   :  { %552 = vmatpush3.bf16.msra.mxu0 %v598_v19 }
  0x59   :  { %553 = vmatprep.subr.bf16.mxu0 %v719_v0 }
  0x5c   :  { %554 = vmatpush3.bf16.msra.mxu0 %v599_v20 }
  0x5d   :  { %555 = vmatprep.subr.bf16.mxu0 %v719_v0 }
  0x60   :  { %556 = vmatpush3.bf16.msra.mxu0 %v600_v21 }
  0x61   :  { %557 = vmatprep.subr.bf16.mxu0 %v719_v0 }
  0x64   :  { %558 = vmatpush3.bf16.msra.mxu0 %v601_v22 }
  0x65   :  { %559 = vmatprep.subr.bf16.mxu0 %v719_v0 }
  0x68   :  { %560 = vmatpush3.bf16.msra.mxu0 %v602_v33 }
  0x69   :  { %561 = vmatprep.subr.bf16.mxu0 %v719_v0 }
  0x6c   :  { %562 = vmatpush3.bf16.msra.mxu0 %v603_v34 }
  0x6d   :  { %563 = vmatprep.subr.bf16.mxu0 %v719_v0 }
  0x70   :  { %564 = vmatpush3.bf16.msra.mxu0 %v604_v35 }
 0x113   :  { %v196_v24 = vpop.f32.mrf.mxu0 }
 0x114   :  { %v197_v26 = vadd.f32 %v454_v23, %v196_v24 }
 0x115   :  { %v527_v25 = vpop.f32.mrf.mxu0 }
 0x116   :  { %v203_v30 = vmax.f32 %v197_v26, 0.0 }
 0x117   :  { %v199_v27 = vpop.f32.mrf.mxu0 }
 0x118   :  { %v200_v28 = vadd.f32 %v454_v23, %v199_v27 }
 0x119   :  { %v528_v29 = vpop.f32.mrf.mxu0 }
 0x11a   :  { %v204_v31 = vmax.f32 %v200_v28, 0.0 }
 0x11c   :  { %v205_v32 = vpack.c.bf16 %v204_v31, %v203_v30 }
 0x11e   :  { %546 = vmatmul.mubr.bf16.vlgmr.msra.gmra.mxu1 %v205_v32 }
 0x1de   :  { %v311_v37 = vpop.f32.mrf.mxu1 }
 0x1df   :  { %v312_v39 = vadd.f32 %v464_v36, %v311_v37 }
 0x1e0   :  { %v547_v38 = vpop.f32.mrf.mxu1 }
 0x1e1   :  { %v318_v43 = vmax.f32 %v312_v39, 0.0 }
 0x1e2   :  { %v314_v40 = vpop.f32.mrf.mxu1 }
 0x1e3   :  { %v315_v41 = vadd.f32 %v464_v36, %v314_v40 }
 0x1e4   :  { %v548_v42 = vpop.f32.mrf.mxu1 }
 0x1e5   :  { %v319_v44 = vmax.f32 %v315_v41, 0.0 }
 0x1e7   :  { %v320_v45 = vpack.c.bf16 %v319_v44, %v318_v43 }
 0x1e9   :  { %566 = vmatmul.mubr.bf16.vlgmr.msra.gmra.mxu0 %v320_v45 }
 0x2a9   :  { %v426_v47 = vpop.f32.mrf.mxu0 }
 0x2aa   :  { %v427_v48 = vadd.f32 %v473_v46, %v426_v47 }
 0x2ab   :  { %v567_v49 = vpop.f32.mrf.mxu0 }
 0x2ac   :  { %433 = vst [vmem:[#allocation10] sm:$0xff] %v427_v48 }
 0x2ad   :  { %v429_v50 = vpop.f32.mrf.mxu0 }
 0x2ae   :  { %v430_v51 = vadd.f32 %v473_v46, %v429_v50 }
 0x2af   :  { %v568_v52 = vpop.f32.mrf.mxu0 }
 0x2b0   :  { %434 = vst [vmem:[#allocation10 + $0x8] sm:$0xff] %v430_v51 }
 0x2b1   :  { %696 = shalt.err (!%p693_p10)
}
 0x2b2   :  { %s722_s26 = smov 128   ;;  %s723_s6 = smov 8  }
 0x2b3   :  { %446 = dma.vmem_to_hbm [thread:$0]  %s441_s25, 256, %s837_s7, [#allocation4], %s722_s26, %s722_s26, %s723_s6  }
 0x2b4   :  { %711 = dma.done.wait [#allocation4], 256  }
 0x2b5   :  { %712 = vsyncadd [#allocation4], 4294967040 }
 0x2b6   :  { %450 = vsyncpa [#allocation3], 1 }
 0x2b7   :  { %451 = vsyncpa [#allocation6], 1 }
 0x2b8   :  { %452 = vsyncpa [#allocation9], 1 }
 0x2b9   :  { %453 = vsyncpa [#allocation4], 1 }

// kernel: tpu_custom_call.1
= control target key start
LH: loop header
LB: loop body
LE: loop exit
PB: predicated region body
PF: predicated region fallthrough
CT: control target
= control target key end

     0   :  { %12 = vsyncpa [#allocation3], 0  ;;  %s830_s0 = inlined_call_operand.hbm [shape: bf16[16,128], index: 0, kind: input, shape index: {}]   ;;  %s831_s1 = inlined_call_operand.hbm [shape: bf16[128,128], index: 1, kind: input, shape index: {}]   ;;  %s832_s2 = inlined_call_operand.vmem [shape: f32[1,128], index: 2, kind: input, shape index: {}]   ;;  %s833_s3 = inlined_call_operand.hbm [shape: bf16[128,128], index: 3, kind: input, shape index: {}]   ;;  %s834_s4 = inlined_call_operand.vmem [shape: f32[1,128], index: 4, kind: input, shape index: {}]   ;;  %s835_s5 = inlined_call_operand.hbm [shape: bf16[128,128], index: 5, kind: input, shape index: {}]   ;;  %s836_s6 = inlined_call_operand.vmem [shape: f32[1,128], index: 6, kind: input, shape index: {}]   ;;  %s837_s7 = inlined_call_operand.hbm [shape: f32[16,128], index: 7, kind: output, shape index: {}]  }
   0x1   :  { %13 = vsyncpa [#allocation6], 0 }
   0x2   :  { %14 = vsyncpa [#allocation9], 0 }
   0x3   :  { %15 = vsyncpa [#allocation4], 0  ;;  %s713_s24 = smov [#allocation5]   ;;  %s714_s26 = smov [#allocation2]  }
   0x4   :  { %s33_s25 = sshll.u32 %s713_s24, 4  ;;  %s21_s27 = sshll.u32 %s714_s26, 4  ;;  %s34_s25 = int_to_ptr.vmem [resolvable:$true] %s33_s25  ;;  %s22_s27 = int_to_ptr.vmem [resolvable:$true] %s21_s27 }
   0x5   :  { %s613_s28 = scalar_lea.vmem %s34_s25, 1024  ;;  %p618_p1 = scmp.lt.s32.totalorder %s34_s25, %s34_s25 }
   0x6   :  { %p614_p0 = scmp.ne.s32.totalorder %s34_s25, %s613_s28  ;;  %p619_p2 = scmp.lt.s32.totalorder %s613_s28, %s613_s28 }
   0x8   :  { %p620_p3 = por %p619_p2, %p618_p1 }
   0xa   :  { %p621_p4 = pnand %p620_p3, %p614_p0 }
   0xc   :  { %624 = shalt.err (!%p621_p4)
}
   0xd   :  { %s715_s29 = smov 64   ;;  %s716_s30 = smov 4  }
   0xe   :  { %39 = dma.hbm_to_vmem [thread:$0]  %s831_s1, 1024, %s34_s25, [#allocation6], %s715_s29, %s715_s29, %s716_s30  }
   0xf   :  { %s633_s10 = scalar_lea.vmem %s22_s27, 128  ;;  %p638_p6 = scmp.lt.s32.totalorder %s22_s27, %s22_s27 }
  0x10   :  { %p634_p5 = scmp.ne.s32.totalorder %s22_s27, %s633_s10  ;;  %p639_p7 = scmp.lt.s32.totalorder %s633_s10, %s633_s10 }
  0x12   :  { %p640_p8 = por %p639_p7, %p638_p6 }
  0x14   :  { %p641_p9 = pnand %p640_p8, %p634_p5 }
  0x16   :  { %644 = shalt.err (!%p641_p9)
}
  0x17   :  { %27 = dma.hbm_to_vmem [thread:$0]  %s830_s0, 128, %s22_s27, [#allocation3], %s715_s29, %s715_s29, %s716_s30  }
  0x18   :  { %s717_s13 = smov [#allocation7]   ;;  %s718_s15 = smov [#allocation8]  }
  0x19   :  { %s47_s14 = sshll.u32 %s717_s13, 4  ;;  %s61_s16 = sshll.u32 %s718_s15, 4  ;;  %s48_s14 = int_to_ptr.vmem [resolvable:$true] %s47_s14  ;;  %s62_s16 = int_to_ptr.vmem [resolvable:$true] %s61_s16 }
  0x1a   :  { %s653_s1 = scalar_lea.vmem %s48_s14, 1024  ;;  %p658_p11 = scmp.lt.s32.totalorder %s48_s14, %s48_s14 }
  0x1b   :  { %p654_p10 = scmp.ne.s32.totalorder %s48_s14, %s653_s1  ;;  %p659_p12 = scmp.lt.s32.totalorder %s653_s1, %s653_s1 }
  0x1d   :  { %p660_p13 = por %p659_p12, %p658_p11 }
  0x1f   :  { %p661_p0 = pnand %p660_p13, %p654_p10 }
  0x21   :  { %664 = shalt.err (!%p661_p0)
}
  0x22   :  { %53 = dma.hbm_to_vmem [thread:$0]  %s833_s3, 1024, %s48_s14, [#allocation6], %s715_s29, %s715_s29, %s716_s30  }
  0x23   :  { %s673_s0 = scalar_lea.vmem %s62_s16, 1024  ;;  %p678_p2 = scmp.lt.s32.totalorder %s62_s16, %s62_s16 }
  0x24   :  { %p674_p1 = scmp.ne.s32.totalorder %s62_s16, %s673_s0  ;;  %p679_p3 = scmp.lt.s32.totalorder %s673_s0, %s673_s0 }
  0x26   :  { %p680_p4 = por %p679_p3, %p678_p2 }
  0x28   :  { %p681_p5 = pnand %p680_p4, %p674_p1 }
  0x2a   :  { %684 = shalt.err (!%p681_p5)
}
  0x2b   :  { %67 = dma.hbm_to_vmem [thread:$0]  %s835_s5, 1024, %s62_s16, [#allocation9], %s715_s29, %s715_s29, %s716_s30  }
  0x2c   :  { %705 = dma.done.wait [#allocation3], 128  }
  0x2d   :  { %706 = vsyncadd [#allocation3], 4294967168 }
  0x2e   :  { %707 = dma.done.wait [#allocation6], 2048  }
  0x2f   :  { %708 = vsyncadd [#allocation6], 4294965248 }
  0x30   :  { %709 = dma.done.wait [#allocation9], 1024  }
  0x31   :  { %710 = vsyncadd [#allocation9], 4294966272  ;;  %v719_v0 = vmov 0.0   ;;  %vm720_vm0 = vmmov 0   ;;  %v580_v1 = vld [vmem:[#allocation5 + $0x38] sm:$0xff]   ;;  %v581_v2 = vld [vmem:[#allocation5 + $0x30] sm:$0xff]  }
  0x32   :  { %509 = vmatprep.subr.bf16.mxu0 %v719_v0  ;;  %525 = vmatprep.mubr.msk.bf16.mxu0 %vm720_vm0, %v719_v0  ;;  %v582_v3 = vld [vmem:[#allocation5 + $0x28] sm:$0xff]   ;;  %v589_v4 = vld [vmem:[#allocation7 + $0x38] sm:$0xff]   ;;  %v583_v5 = vld [vmem:[#allocation5 + $0x20] sm:$0xff]   ;;  %s721_s24 = smov [#allocation10]  }
  0x33   :  { %529 = vmatprep.subr.bf16.mxu1 %v719_v0  ;;  %545 = vmatprep.mubr.msk.bf16.mxu1 %vm720_vm0, %v719_v0  ;;  %v590_v6 = vld [vmem:[#allocation7 + $0x30] sm:$0xff]   ;;  %v584_v7 = vld [vmem:[#allocation5 + $0x18] sm:$0xff]   ;;  %v591_v8 = vld [vmem:[#allocation7 + $0x28] sm:$0xff]   ;;  %s440_s25 = sshll.u32 %s721_s24, 4  ;;  %s441_s25 = int_to_ptr.vmem [resolvable:$true] %s440_s25 }
  0x34   :  { %510 = vmatpush3.bf16.msra.mxu0 %v580_v1  ;;  %530 = vmatpush3.bf16.msra.mxu1 %v589_v4  ;;  %v585_v9 = vld [vmem:[#allocation5 + $0x10] sm:$0xff]   ;;  %v592_v10 = vld [vmem:[#allocation7 + $0x20] sm:$0xff]   ;;  %v586_v11 = vld [vmem:[#allocation5 + $0x8] sm:$0xff]   ;;  %p690_p7 = scmp.lt.s32.totalorder %s441_s25, %s441_s25 }
  0x35   :  { %511 = vmatprep.subr.bf16.mxu0 %v719_v0  ;;  %531 = vmatprep.subr.bf16.mxu1 %v719_v0  ;;  %v593_v12 = vld [vmem:[#allocation7 + $0x18] sm:$0xff]   ;;  %v587_v13 = vld [vmem:[#allocation5] sm:$0xff]   ;;  %v594_v15 = vld [vmem:[#allocation7 + $0x10] sm:$0xff]  }
  0x36   :  { %v588_v14 = vld [vmem:[#allocation2] sm:$0xff]   ;;  %v595_v16 = vld [vmem:[#allocation7 + $0x8] sm:$0xff]   ;;  %v596_v17 = vld [vmem:[#allocation7] sm:$0xff]  }
  0x37   :  { %v597_v18 = vld [vmem:[#allocation8 + $0x38] sm:$0xff]   ;;  %v598_v19 = vld [vmem:[#allocation8 + $0x30] sm:$0xff]   ;;  %v599_v20 = vld [vmem:[#allocation8 + $0x28] sm:$0xff]  }
  0x38   :  { %512 = vmatpush3.bf16.msra.mxu0 %v581_v2  ;;  %532 = vmatpush3.bf16.msra.mxu1 %v590_v6  ;;  %v600_v21 = vld [vmem:[#allocation8 + $0x20] sm:$0xff]   ;;  %v601_v22 = vld [vmem:[#allocation8 + $0x18] sm:$0xff]   ;;  %v602_v33 = vld [vmem:[#allocation8 + $0x10] sm:$0xff]  }
  0x39   :  { %513 = vmatprep.subr.bf16.mxu0 %v719_v0  ;;  %533 = vmatprep.subr.bf16.mxu1 %v719_v0  ;;  %v454_v23 = vld [vmem:[%s832_s2] ss:$0 sm:$0xff]  ;;  %v603_v34 = vld [vmem:[#allocation8 + $0x8] sm:$0xff]   ;;  %v604_v35 = vld [vmem:[#allocation8] sm:$0xff]  }
  0x3a   :  { %v464_v36 = vld [vmem:[%s834_s4] ss:$0 sm:$0xff]  ;;  %s685_s4 = scalar_lea.vmem %s441_s25, 256 }
  0x3b   :  { %v473_v46 = vld [vmem:[%s836_s6] ss:$0 sm:$0xff]  ;;  %p686_p6 = scmp.ne.s32.totalorder %s441_s25, %s685_s4  ;;  %p691_p8 = scmp.lt.s32.totalorder %s685_s4, %s685_s4 }
  0x3c   :  { %514 = vmatpush3.bf16.msra.mxu0 %v582_v3  ;;  %534 = vmatpush3.bf16.msra.mxu1 %v591_v8 }
  0x3d   :  { %515 = vmatprep.subr.bf16.mxu0 %v719_v0  ;;  %535 = vmatprep.subr.bf16.mxu1 %v719_v0  ;;  %p692_p9 = por %p691_p8, %p690_p7 }
  0x3f   :  { %p693_p10 = pnand %p692_p9, %p686_p6 }
  0x40   :  { %516 = vmatpush3.bf16.msra.mxu0 %v583_v5  ;;  %536 = vmatpush3.bf16.msra.mxu1 %v592_v10 }
  0x41   :  { %517 = vmatprep.subr.bf16.mxu0 %v719_v0  ;;  %537 = vmatprep.subr.bf16.mxu1 %v719_v0 }
  0x44   :  { %518 = vmatpush3.bf16.msra.mxu0 %v584_v7  ;;  %538 = vmatpush3.bf16.msra.mxu1 %v593_v12 }
  0x45   :  { %519 = vmatprep.subr.bf16.mxu0 %v719_v0  ;;  %539 = vmatprep.subr.bf16.mxu1 %v719_v0 }
  0x48   :  { %520 = vmatpush3.bf16.msra.mxu0 %v585_v9  ;;  %540 = vmatpush3.bf16.msra.mxu1 %v594_v15 }
  0x49   :  { %521 = vmatprep.subr.bf16.mxu0 %v719_v0  ;;  %541 = vmatprep.subr.bf16.mxu1 %v719_v0 }
  0x4c   :  { %522 = vmatpush3.bf16.msra.mxu0 %v586_v11  ;;  %542 = vmatpush3.bf16.msra.mxu1 %v595_v16 }
  0x4d   :  { %523 = vmatprep.subr.bf16.mxu0 %v719_v0  ;;  %543 = vmatprep.subr.bf16.mxu1 %v719_v0 }
  0x50   :  { %524 = vmatpush3.bf16.msra.mxu0 %v587_v13  ;;  %544 = vmatpush3.bf16.msra.mxu1 %v596_v17 }
  0x51   :  { %549 = vmatprep.subr.bf16.mxu0 %v719_v0 }
  0x53   :  { %526 = vmatmul.mubr.bf16.vlgmr.msra.gmra.mxu0 %v588_v14 }
  0x54   :  { %565 = vmatprep.mubr.msk.bf16.mxu0 %vm720_vm0, %v719_v0  ;;  %550 = vmatpush3.bf16.msra.mxu0 %v597_v18 }
  0x55   :  { %551 = vmatprep.subr.bf16.mxu0 %v719_v0 }
  0x58   :  { %552 = vmatpush3.bf16.msra.mxu0 %v598_v19 }
  0x59   :  { %553 = vmatprep.subr.bf16.mxu0 %v719_v0 }
  0x5c   :  { %554 = vmatpush3.bf16.msra.mxu0 %v599_v20 }
  0x5d   :  { %555 = vmatprep.subr.bf16.mxu0 %v719_v0 }
  0x60   :  { %556 = vmatpush3.bf16.msra.mxu0 %v600_v21 }
  0x61   :  { %557 = vmatprep.subr.bf16.mxu0 %v719_v0 }
  0x64   :  { %558 = vmatpush3.bf16.msra.mxu0 %v601_v22 }
  0x65   :  { %559 = vmatprep.subr.bf16.mxu0 %v719_v0 }
  0x68   :  { %560 = vmatpush3.bf16.msra.mxu0 %v602_v33 }
  0x69   :  { %561 = vmatprep.subr.bf16.mxu0 %v719_v0 }
  0x6c   :  { %562 = vmatpush3.bf16.msra.mxu0 %v603_v34 }
  0x6d   :  { %563 = vmatprep.subr.bf16.mxu0 %v719_v0 }
  0x70   :  { %564 = vmatpush3.bf16.msra.mxu0 %v604_v35 }
 0x113   :  { %v196_v24 = vpop.f32.mrf.mxu0 }
 0x114   :  { %v197_v26 = vadd.f32 %v454_v23, %v196_v24 }
 0x115   :  { %v527_v25 = vpop.f32.mrf.mxu0 }
 0x116   :  { %v203_v30 = vmax.f32 %v197_v26, 0.0 }
 0x117   :  { %v199_v27 = vpop.f32.mrf.mxu0 }
 0x118   :  { %v200_v28 = vadd.f32 %v454_v23, %v199_v27 }
 0x119   :  { %v528_v29 = vpop.f32.mrf.mxu0 }
 0x11a   :  { %v204_v31 = vmax.f32 %v200_v28, 0.0 }
 0x11c   :  { %v205_v32 = vpack.c.bf16 %v204_v31, %v203_v30 }
 0x11e   :  { %546 = vmatmul.mubr.bf16.vlgmr.msra.gmra.mxu1 %v205_v32 }
 0x1de   :  { %v311_v37 = vpop.f32.mrf.mxu1 }
 0x1df   :  { %v312_v39 = vadd.f32 %v464_v36, %v311_v37 }
 0x1e0   :  { %v547_v38 = vpop.f32.mrf.mxu1 }
 0x1e1   :  { %v318_v43 = vmax.f32 %v312_v39, 0.0 }
 0x1e2   :  { %v314_v40 = vpop.f32.mrf.mxu1 }
 0x1e3   :  { %v315_v41 = vadd.f32 %v464_v36, %v314_v40 }
 0x1e4   :  { %v548_v42 = vpop.f32.mrf.mxu1 }
 0x1e5   :  { %v319_v44 = vmax.f32 %v315_v41, 0.0 }
 0x1e7   :  { %v320_v45 = vpack.c.bf16 %v319_v44, %v318_v43 }
 0x1e9   :  { %566 = vmatmul.mubr.bf16.vlgmr.msra.gmra.mxu0 %v320_v45 }
 0x2a9   :  { %v426_v47 = vpop.f32.mrf.mxu0 }
 0x2aa   :  { %v427_v48 = vadd.f32 %v473_v46, %v426_v47 }
 0x2ab   :  { %v567_v49 = vpop.f32.mrf.mxu0 }
 0x2ac   :  { %433 = vst [vmem:[#allocation10] sm:$0xff] %v427_v48 }
 0x2ad   :  { %v429_v50 = vpop.f32.mrf.mxu0 }
 0x2ae   :  { %v430_v51 = vadd.f32 %v473_v46, %v429_v50 }
 0x2af   :  { %v568_v52 = vpop.f32.mrf.mxu0 }
 0x2b0   :  { %434 = vst [vmem:[#allocation10 + $0x8] sm:$0xff] %v430_v51 }
 0x2b1   :  { %696 = shalt.err (!%p693_p10)
}
 0x2b2   :  { %s722_s26 = smov 128   ;;  %s723_s6 = smov 8  }
 0x2b3   :  { %446 = dma.vmem_to_hbm [thread:$0]  %s441_s25, 256, %s837_s7, [#allocation4], %s722_s26, %s722_s26, %s723_s6  }
 0x2b4   :  { %711 = dma.done.wait [#allocation4], 256  }
 0x2b5   :  { %712 = vsyncadd [#allocation4], 4294967040 }
 0x2b6   :  { %450 = vsyncpa [#allocation3], 1 }
 0x2b7   :  { %451 = vsyncpa [#allocation6], 1 }
 0x2b8   :  { %452 = vsyncpa [#allocation9], 1 }
 0x2b9   :  { %453 = vsyncpa [#allocation4], 1 }

</bundles_post_ra>
